<compile_context>
chip_gen: v6e
topology: v6e:2x2x1
jax: 0.10.0
libtpu: 0.0.40
codegen_flags: <defaults>
</compile_context>

<pallas_src>
import functools

import jax
import jax.numpy as jnp
from jax import lax
from jax.experimental import pallas as pl
from jax.experimental.pallas import tpu as pltpu

_NEG = -1e30                    # finite "minus infinity" (avoids inf-inf NaNs)
_VMEM_LIMIT = 48 * 1024 * 1024  # safe on v5e/v6e (128 MiB) and v7x (64 MiB)


# ---------------------------------------------------------------------------
# Phase 1: fused projections + flash softmax stats + gd^T accumulation + V out
# ---------------------------------------------------------------------------
def _phase1_kernel(x_ref, w_ref, b_ref, gd_ref, mv_ref, v_ref,
                   mb_ref, sb_ref, sv_ref, *,
                   c_m, c_n, tile_n, n_valid, n_total, mm_dtype):
    """x_ref: (C, TN) bf16; w_ref: (c_m+2c_n, C) bf16; b_ref: (c_m+2c_n, 1) f32.

    Outputs:
      gd_ref: (c_n, c_m) f32  normalized global-descriptor (transposed),
              resident across the tile axis (per batch).
      mv_ref: (c_n, 1)   f32  final per-channel spatial max of V, resident.
      v_ref : (c_n, TN)  bf16 V logits tile (streamed, consumed by phase 2).
    Scratch: running max of B, running sums of exp(B-mB) and exp(V-mV).
    """
    j = pl.program_id(1)

    @pl.when(j == 0)
    def _init():
        gd_ref[...] = jnp.zeros_like(gd_ref)
        mv_ref[...] = jnp.full(mv_ref.shape, _NEG, mv_ref.dtype)
        mb_ref[...] = jnp.full(mb_ref.shape, _NEG, mb_ref.dtype)
        sb_ref[...] = jnp.zeros_like(sb_ref)
        sv_ref[...] = jnp.zeros_like(sv_ref)

    # One wide MXU matmul for all three 1x1x1 convs (bf16 in, fp32 accum).
    # Note: keep c_m / c_n multiples of 8 so the row splits below are free
    # sublane-aligned views (true for typical A^2-Nets configs).
    proj = jnp.dot(w_ref[...], x_ref[...],
                   preferred_element_type=jnp.float32) + b_ref[...]
    A = proj[:c_m, :]                                             # (c_m, TN)
    B = proj[c_m:c_m + c_n, :]                                    # (c_n, TN)
    V = proj[c_m + c_n:, :]                                       # (c_n, TN)

    # V is streamed to HBM in bf16; use the *same* rounded values for the
    # softmax stats so phase 2's numerator matches the denominator exactly.
    v_bf = V.astype(mm_dtype)
    v_use = v_bf.astype(jnp.float32)
    v_ref[...] = v_bf

    if n_valid != n_total:  # static: only emitted when N is not a tile multiple
        col = j * tile_n + lax.broadcasted_iota(jnp.int32, (1, tile_n), 1)
        invalid = col >= n_valid
        A = jnp.where(invalid, 0.0, A)
        B = jnp.where(invalid, _NEG, B)
        v_use = jnp.where(invalid, _NEG, v_use)

    # ---- softmax(B) branch: gd^T[c,m] += sum_n exp(B[c,n]-mB[c]) * A[m,n]
    mb_new = jnp.maximum(mb_ref[...], jnp.max(B, axis=1, keepdims=True))
    corr_b = jnp.exp(mb_ref[...] - mb_new)                        # (c_n, 1)
    e_b = jnp.exp(B - mb_new)                                     # (c_n, TN)
    sb_ref[...] = sb_ref[...] * corr_b + jnp.sum(e_b, axis=1, keepdims=True)
    # Tiny (c_n, c_m) accumulation: done in fp32 (MXU has plenty of slack here,
    # and this was the dominant numerical error source in the bf16 version).
    gd_ref[...] = gd_ref[...] * corr_b + lax.dot_general(
        e_b, A, (((1,), (1,)), ((), ())), preferred_element_type=jnp.float32)
    mb_ref[...] = mb_new

    # ---- softmax(V) branch: only the running max / sum are needed here.
    mv_new = jnp.maximum(mv_ref[...], jnp.max(v_use, axis=1, keepdims=True))
    sv_ref[...] = (sv_ref[...] * jnp.exp(mv_ref[...] - mv_new)
                   + jnp.sum(jnp.exp(v_use - mv_new), axis=1, keepdims=True))
    mv_ref[...] = mv_new

    # ---- fold BOTH softmax denominators into gd^T (exact reciprocal: runs
    # once per batch, so the cost is negligible and accuracy is better).
    @pl.when(j == pl.num_programs(1) - 1)
    def _finalize():
        gd_ref[...] = gd_ref[...] * (1.0 / (sb_ref[...] * sv_ref[...]))


# ---------------------------------------------------------------------------
# Phase 2: consume V logits, apply gd^T, reconstruct conv, optional residual
# ---------------------------------------------------------------------------
def _phase2_kernel(*refs, res, reconstruct, mm_dtype):
    idx = 0
    v_ref = refs[idx]; idx += 1                    # (c_n, TN) bf16
    x_ref = None
    if res:
        x_ref = refs[idx]; idx += 1                # (C, TN) bf16  (residual only)
    gd_ref = refs[idx]; idx += 1                   # (c_n, c_m) f32 (folded norms)
    mv_ref = refs[idx]; idx += 1                   # (c_n, 1)   f32
    if reconstruct:
        wr_ref = refs[idx]; idx += 1               # (c_out, c_m) bf16
        br_ref = refs[idx]; idx += 1               # (c_out, 1)   f32
    o_ref = refs[idx]                              # (c_out, TN)

    e_v = jnp.exp(v_ref[...].astype(jnp.float32) - mv_ref[...])   # (c_n, TN)
    # Z[m,n] = sum_c gd^T[c,m] * e_v[c,n]   (softmax norms already inside gd^T).
    # Out-of-range columns (partial boundary tile) are per-column independent
    # and their stores are masked by Pallas, so no extra masking is needed.
    z = lax.dot_general(gd_ref[...], e_v, (((0,), (0,)), ((), ())),
                        preferred_element_type=jnp.float32)       # (c_m, TN)
    if reconstruct:
        out = jnp.dot(wr_ref[...], z.astype(mm_dtype),
                      preferred_element_type=jnp.float32) + br_ref[...]
    else:
        out = z                                    # no identity-matmul round trip
    if res:
        out = out + x_ref[...].astype(jnp.float32)
    o_ref[...] = out.astype(o_ref.dtype)


# ---------------------------------------------------------------------------
# Wrapper
# ---------------------------------------------------------------------------
def _choose_tile_n(n, c, itemsize, target_bytes=2 << 20):
    """Spatial tile TN: ~2 MiB per streamed x tile, multiple of 128, or == N."""
    tn = (target_bytes // max(1, itemsize * c)) // 128 * 128
    tn = max(512, min(tn, 8192))
    if tn >= n:
        return n
    return tn


def double_attention(x, params, *, res=False, reconstruct=True,
                     tile_n=None, matmul_dtype=jnp.bfloat16):
    """x: (b, c, h, w, d).  params: {'wA','bA','wB','bB','wV','bV'[,'wR','bR']}."""
    b, c, h, w, d = x.shape
    N = h * w * d
    c_m = params["wA"].shape[0]
    c_n = params["wB"].shape[0]
    c_f = c_m + 2 * c_n

    itemsize = jnp.dtype(matmul_dtype).itemsize
    if tile_n is None:
        tn = _choose_tile_n(N, c, itemsize)
    else:
        tn = min(int(tile_n), N)
        if tn < N:
            tn = max(128, (tn // 128) * 128)   # (8,128) layout constraint
    n_tiles = pl.cdiv(N, tn)
    n_total = n_tiles * tn                      # logical (unmaterialized) extent

    # NCDHW -> (b, C, N): pure reshape + ONE bf16 cast.  No pad, no transpose.
    x_f = x.reshape(b, c, N).astype(matmul_dtype)

    # Fused projection weights / biases (single wide MXU matmul in phase 1).
    w_fused = jnp.concatenate(
        [params["wA"], params["wB"], params["wV"]], axis=0).astype(matmul_dtype)
    b_fused = jnp.concatenate(
        [params["bA"], params["bB"], params["bV"]])[:, None].astype(jnp.float32)

    c_out = c if reconstruct else c_m

    # ---- Phase 1: stream x once; produce folded gd^T, V column-max, V logits.
    gd_t, m_v, v_logits = pl.pallas_call(
        functools.partial(_phase1_kernel, c_m=c_m, c_n=c_n, tile_n=tn,
                          n_valid=N, n_total=n_total, mm_dtype=matmul_dtype),
        out_shape=(jax.ShapeDtypeStruct((b, c_n, c_m), jnp.float32),
                   jax.ShapeDtypeStruct((b, c_n, 1), jnp.float32),
                   jax.ShapeDtypeStruct((b, c_n, N), matmul_dtype)),
        grid_spec=pltpu.PrefetchScalarGridSpec(
            num_scalar_prefetch=0,
            grid=(b, n_tiles),
            in_specs=[
                pl.BlockSpec((None, c, tn), lambda i, j: (i, 0, j)),   # x tile
                pl.BlockSpec((c_f, c), lambda i, j: (0, 0)),           # fused W
                pl.BlockSpec((c_f, 1), lambda i, j: (0, 0)),           # fused b
            ],
            out_specs=(
                pl.BlockSpec((None, c_n, c_m), lambda i, j: (i, 0, 0)),  # gd^T
                pl.BlockSpec((None, c_n, 1), lambda i, j: (i, 0, 0)),    # max V
                pl.BlockSpec((None, c_n, tn), lambda i, j: (i, 0, j)),   # V logits
            ),
            scratch_shapes=[
                pltpu.VMEM((c_n, 1), jnp.float32),   # running max of B
                pltpu.VMEM((c_n, 1), jnp.float32),   # running sum exp(B - mB)
                pltpu.VMEM((c_n, 1), jnp.float32),   # running sum exp(V - mV)
            ]),
        compiler_params=pltpu.CompilerParams(
            dimension_semantics=("parallel", "arbitrary"),
            vmem_limit_bytes=_VMEM_LIMIT),
    )(x_f, w_fused, b_fused)

    # ---- Phase 2: stream the small V slab (+ x only for the residual),
    #      emit lane-dense (c_out, TN) output tiles.
    p2_in_specs = [pl.BlockSpec((None, c_n, tn), lambda i, j: (i, 0, j))]   # V
    p2_operands = [v_logits]
    if res:
        p2_in_specs.append(pl.BlockSpec((None, c, tn), lambda i, j: (i, 0, j)))
        p2_operands.append(x_f)
    p2_in_specs += [
        pl.BlockSpec((None, c_n, c_m), lambda i, j: (i, 0, 0)),    # gd^T
        pl.BlockSpec((None, c_n, 1), lambda i, j: (i, 0, 0)),      # max V
    ]
    p2_operands += [gd_t, m_v]
    if reconstruct:
        w_r = params["wR"].astype(matmul_dtype)
        b_r = params["bR"][:, None].astype(jnp.float32)
        p2_in_specs += [pl.BlockSpec((c_out, c_m), lambda i, j: (0, 0)),
                        pl.BlockSpec((c_out, 1), lambda i, j: (0, 0))]
        p2_operands += [w_r, b_r]

    out_f = pl.pallas_call(
        functools.partial(_phase2_kernel, res=res, reconstruct=reconstruct,
                          mm_dtype=matmul_dtype),
        out_shape=jax.ShapeDtypeStruct((b, c_out, N), x.dtype),
        grid_spec=pltpu.PrefetchScalarGridSpec(
            num_scalar_prefetch=0,
            grid=(b, n_tiles),
            in_specs=p2_in_specs,
            out_specs=pl.BlockSpec((None, c_out, tn), lambda i, j: (i, 0, j)),
        ),
        compiler_params=pltpu.CompilerParams(
            dimension_semantics=("parallel", "parallel"),
            vmem_limit_bytes=_VMEM_LIMIT),
    )(*p2_operands)

    return out_f.reshape(b, c_out, h, w, d)


# ---------------------------------------------------------------------------
# Parameter init (matches DoubleAttention.init_weights) and pure-JAX reference
# ---------------------------------------------------------------------------
def init_params(key, in_channels, c_m, c_n, reconstruct=True):
    k1, k2, k3, k4 = jax.random.split(key, 4)

    def kaiming(k, out_c, in_c):
        std = (2.0 / out_c) ** 0.5   # kaiming_normal_(mode='fan_out'), 1x1x1 conv
        return std * jax.random.normal(k, (out_c, in_c), dtype=jnp.float32)

    p = {
        "wA": kaiming(k1, c_m, in_channels), "bA": jnp.zeros((c_m,), jnp.float32),
        "wB": kaiming(k2, c_n, in_channels), "bB": jnp.zeros((c_n,), jnp.float32),
        "wV": kaiming(k3, c_n, in_channels), "bV": jnp.zeros((c_n,), jnp.float32),
    }
    if reconstruct:
        p["wR"] = kaiming(k4, in_channels, c_m)
        p["bR"] = jnp.zeros((in_channels,), jnp.float32)
    return p


def double_attention_ref(x, params, *, res=False, reconstruct=True):
    """Pure-JAX fp32 reference mirroring the PyTorch forward exactly."""
    b, c, h, w, d = x.shape
    N = h * w * d
    conv = lambda t, wgt, bias: (jnp.einsum("oc,bcn->bon", wgt, t)
                                 + bias[None, :, None])
    xf = x.reshape(b, c, N)
    A = conv(xf, params["wA"], params["bA"])                       # (b, c_m, N)
    Bm = jax.nn.softmax(conv(xf, params["wB"], params["bB"]), -1)  # (b, c_n, N)
    Vm = jax.nn.softmax(conv(xf, params["wV"], params["bV"]), -1)  # (b, c_n, N)
    gd = jnp.einsum("bmn,bcn->bmc", A, Bm)                         # (b, c_m, c_n)
    Z = jnp.einsum("bmc,bcn->bmn", gd, Vm)                         # (b, c_m, N)
    if reconstruct:
        Z = conv(Z, params["wR"], params["bR"])                    # (b, c, N)
    out = Z.reshape(b, Z.shape[1], h, w, d)
    if res:
        out = out + x
    return out


def _check(out, ref, tag):
    assert out.shape == ref.shape, f"{tag}: shape {out.shape} vs {ref.shape}"
    err = float(jnp.max(jnp.abs(out - ref)) / (jnp.max(jnp.abs(ref)) + 1e-12))
    assert err < 3e-2, f"{tag}: normalized max error {err}"


if __name__ == "__main__":
    key = jax.random.PRNGKey(0)
    kx1, kx2, kx3, kp1, kp2, kp3, kb = jax.random.split(key, 7)

    # Test 1: multi-tile flash path (N = 512, 4 tiles of 128), c_m != c_n.
    b, c, h, w, d = 2, 8, 8, 8, 8
    c_m, c_n = 16, 8
    x1 = jax.random.normal(kx1, (b, c, h, w, d), dtype=jnp.float32)
    p1 = init_params(kp1, c, c_m, c_n)
    out1 = jax.block_until_ready(double_attention(x1, p1, res=False, tile_n=128))
    _check(out1, double_attention_ref(x1, p1, res=False), "test1")

    # Test 2: non-tile-multiple N (216, masked partial boundary tile) +
    # residual, with non-zero biases to exercise the bias path.
    b, c, h, w, d = 2, 8, 6, 6, 6
    x2 = jax.random.normal(kx2, (b, c, h, w, d), dtype=jnp.float32)
    p2 = init_params(kp2, c, c_m, c_n)
    kb1, kb2, kb3, kb4 = jax.random.split(kb, 4)
    p2["bA"] = 0.1 * jax.random.normal(kb1, (c_m,), jnp.float32)
    p2["bB"] = 0.1 * jax.random.normal(kb2, (c_n,), jnp.float32)
    p2["bV"] = 0.1 * jax.random.normal(kb3, (c_n,), jnp.float32)
    p2["bR"] = 0.1 * jax.random.normal(kb4, (c,), jnp.float32)
    out2 = jax.block_until_ready(double_attention(x2, p2, res=True, tile_n=128))
    _check(out2, double_attention_ref(x2, p2, res=True), "test2")

    # Test 3: reconstruct=False (no wR matmul), single tile, default tiling.
    b, c, h, w, d = 1, 8, 4, 4, 4
    x3 = jax.random.normal(kx3, (b, c, h, w, d), dtype=jnp.float32)
    p3 = init_params(kp3, c, c_m, c_n, reconstruct=False)
    out3 = jax.block_until_ready(
        double_attention(x3, p3, res=False, reconstruct=False))
    _check(out3, double_attention_ref(x3, p3, res=False, reconstruct=False),
           "test3")

    print("KERNEL_OK")
</pallas_src>

<mosaic_0001>
module attributes {stable_mosaic.version = 11 : i64} {
  func.func @_phase1_kernel(%arg0: i32, %arg1: i32, %arg2: memref<1x8x128xbf16, #tpu.memory_space<vmem>>, %arg3: memref<32x8xbf16, #tpu.memory_space<vmem>>, %arg4: memref<32x1xf32, #tpu.memory_space<vmem>>, %arg5: memref<1x8x16xf32, #tpu.memory_space<vmem>>, %arg6: memref<1x8x1xf32, #tpu.memory_space<vmem>>, %arg7: memref<1x8x128xbf16, #tpu.memory_space<vmem>>, %arg8: memref<8x1xf32, #tpu.memory_space<vmem>>, %arg9: memref<8x1xf32, #tpu.memory_space<vmem>>, %arg10: memref<8x1xf32, #tpu.memory_space<vmem>>) attributes {dimension_semantics = [#tpu.dimension_semantics<parallel>, #tpu.dimension_semantics<arbitrary>], iteration_bounds = array<i64: 2, 4>, scalar_prefetch = 0 : i64, scratch_operands = 3 : i64, tpu.core_type = #tpu.core_type<tc>, window_params = [{transform_indices = @transform_0, window_bounds = array<i64: 1, 8, 128>}, {pipeline_mode = #tpu.pipeline_mode<synchronous>, transform_indices = @transform_1, window_bounds = array<i64: 32, 8>}, {pipeline_mode = #tpu.pipeline_mode<synchronous>, transform_indices = @transform_2, window_bounds = array<i64: 32, 1>}, {transform_indices = @transform_3, window_bounds = array<i64: 1, 8, 16>}, {transform_indices = @transform_4, window_bounds = array<i64: 1, 8, 1>}, {transform_indices = @transform_5, window_bounds = array<i64: 1, 8, 128>}]} {
    %c0_i32 = arith.constant 0 : i32
    %0 = arith.cmpi eq, %arg1, %c0_i32 : i32
    %1 = arith.extui %0 : i1 to i32
    %c0_i32_0 = arith.constant 0 : i32
    %2 = arith.cmpi ne, %1, %c0_i32_0 : i32
    scf.if %2 {
      %cst_45 = arith.constant 0.000000e+00 : f32
      %68 = vector.broadcast %cst_45 : f32 to vector<8x16xf32>
      %c0_46 = arith.constant 0 : index
      %c0_47 = arith.constant 0 : index
      %c0_48 = arith.constant 0 : index
      %69 = vector.load %arg5[%c0_46, %c0_47, %c0_48] : memref<1x8x16xf32, #tpu.memory_space<vmem>>, vector<1x8x16xf32>
      %70 = vector.shape_cast %69 : vector<1x8x16xf32> to vector<8x16xf32>
      %71 = vector.shape_cast %68 : vector<8x16xf32> to vector<1x8x16xf32>
      tpu.vector_store %arg5[%c0_46, %c0_47, %c0_48], %71 {strides = array<i32>} : memref<1x8x16xf32, #tpu.memory_space<vmem>>, vector<1x8x16xf32>,
      %cst_49 = arith.constant -1.000000e+30 : f32
      %72 = vector.broadcast %cst_49 : f32 to vector<8x1xf32>
      %c0_50 = arith.constant 0 : index
      %c0_51 = arith.constant 0 : index
      %c0_52 = arith.constant 0 : index
      %73 = vector.load %arg6[%c0_50, %c0_51, %c0_52] : memref<1x8x1xf32, #tpu.memory_space<vmem>>, vector<1x8x1xf32>
      %74 = vector.shape_cast %73 : vector<1x8x1xf32> to vector<8x1xf32>
      %75 = vector.shape_cast %72 : vector<8x1xf32> to vector<1x8x1xf32>
      tpu.vector_store %arg6[%c0_50, %c0_51, %c0_52], %75 {strides = array<i32>} : memref<1x8x1xf32, #tpu.memory_space<vmem>>, vector<1x8x1xf32>,
      %cst_53 = arith.constant -1.000000e+30 : f32
      %76 = vector.broadcast %cst_53 : f32 to vector<8x1xf32>
      %c0_54 = arith.constant 0 : index
      %c0_55 = arith.constant 0 : index
      %77 = vector.load %arg8[%c0_54, %c0_55] : memref<8x1xf32, #tpu.memory_space<vmem>>, vector<8x1xf32>
      tpu.vector_store %arg8[%c0_54, %c0_55], %76 {strides = array<i32>} : memref<8x1xf32, #tpu.memory_space<vmem>>, vector<8x1xf32>,
      %cst_56 = arith.constant 0.000000e+00 : f32
      %78 = vector.broadcast %cst_56 : f32 to vector<8x1xf32>
      %c0_57 = arith.constant 0 : index
      %c0_58 = arith.constant 0 : index
      %79 = vector.load %arg9[%c0_57, %c0_58] : memref<8x1xf32, #tpu.memory_space<vmem>>, vector<8x1xf32>
      tpu.vector_store %arg9[%c0_57, %c0_58], %78 {strides = array<i32>} : memref<8x1xf32, #tpu.memory_space<vmem>>, vector<8x1xf32>,
      %cst_59 = arith.constant 0.000000e+00 : f32
      %80 = vector.broadcast %cst_59 : f32 to vector<8x1xf32>
      %c0_60 = arith.constant 0 : index
      %c0_61 = arith.constant 0 : index
      %81 = vector.load %arg10[%c0_60, %c0_61] : memref<8x1xf32, #tpu.memory_space<vmem>>, vector<8x1xf32>
      tpu.vector_store %arg10[%c0_60, %c0_61], %80 {strides = array<i32>} : memref<8x1xf32, #tpu.memory_space<vmem>>, vector<8x1xf32>,
    } else {
    }
    %c0 = arith.constant 0 : index
    %c0_1 = arith.constant 0 : index
    %3 = vector.load %arg3[%c0, %c0_1] : memref<32x8xbf16, #tpu.memory_space<vmem>>, vector<32x8xbf16>
    %c0_2 = arith.constant 0 : index
    %c0_3 = arith.constant 0 : index
    %c0_4 = arith.constant 0 : index
    %4 = vector.load %arg2[%c0_2, %c0_3, %c0_4] : memref<1x8x128xbf16, #tpu.memory_space<vmem>>, vector<1x8x128xbf16>
    %5 = vector.shape_cast %4 : vector<1x8x128xbf16> to vector<8x128xbf16>
    %cst = arith.constant dense<0.000000e+00> : vector<32x128xf32>
    %6 = tpu.matmul %3, %5, %cst {dimension_numbers = #tpu.dot_dimension_numbers<[1], [0], [0], [1], [0, 0, 1, 1], [], []>} : vector<32x8xbf16>, vector<8x128xbf16>, vector<32x128xf32> -> vector<32x128xf32>
    %c0_5 = arith.constant 0 : index
    %c0_6 = arith.constant 0 : index
    %7 = vector.load %arg4[%c0_5, %c0_6] : memref<32x1xf32, #tpu.memory_space<vmem>>, vector<32x1xf32>
    %8 = vector.broadcast %7 : vector<32x1xf32> to vector<32x128xf32>
    %9 = arith.addf %6, %8 : vector<32x128xf32>
    %10 = vector.extract_strided_slice %9 {offsets = [0, 0], sizes = [16, 128], strides = [1, 1]} : vector<32x128xf32> to vector<16x128xf32>
    %11 = vector.extract_strided_slice %9 {offsets = [16, 0], sizes = [8, 128], strides = [1, 1]} : vector<32x128xf32> to vector<8x128xf32>
    %12 = vector.extract_strided_slice %9 {offsets = [24, 0], sizes = [8, 128], strides = [1, 1]} : vector<32x128xf32> to vector<8x128xf32>
    %13 = arith.truncf %12 : vector<8x128xf32> to vector<8x128xbf16>
    %14 = arith.extf %13 : vector<8x128xbf16> to vector<8x128xf32>
    %c0_7 = arith.constant 0 : index
    %c0_8 = arith.constant 0 : index
    %c0_9 = arith.constant 0 : index
    %15 = vector.load %arg7[%c0_7, %c0_8, %c0_9] : memref<1x8x128xbf16, #tpu.memory_space<vmem>>, vector<1x8x128xbf16>
    %16 = vector.shape_cast %15 : vector<1x8x128xbf16> to vector<8x128xbf16>
    %17 = vector.shape_cast %13 : vector<8x128xbf16> to vector<1x8x128xbf16>
    tpu.vector_store %arg7[%c0_7, %c0_8, %c0_9], %17 {strides = array<i32>} : memref<1x8x128xbf16, #tpu.memory_space<vmem>>, vector<1x8x128xbf16>,
    %c0_10 = arith.constant 0 : index
    %c0_11 = arith.constant 0 : index
    %18 = vector.load %arg8[%c0_10, %c0_11] : memref<8x1xf32, #tpu.memory_space<vmem>>, vector<8x1xf32>
    %cst_12 = arith.constant dense<0xFF800000> : vector<8xf32>
    %19 = vector.multi_reduction <maximumf>, %11, %cst_12 [1] : vector<8x128xf32> to vector<8xf32>
    %20 = vector.shape_cast %19 : vector<8xf32> to vector<8x1xf32>
    %21 = arith.maximumf %18, %20 : vector<8x1xf32>
    %c0_13 = arith.constant 0 : index
    %c0_14 = arith.constant 0 : index
    %22 = vector.load %arg8[%c0_13, %c0_14] : memref<8x1xf32, #tpu.memory_space<vmem>>, vector<8x1xf32>
    %23 = arith.subf %22, %21 : vector<8x1xf32>
    %24 = math.exp %23 : vector<8x1xf32>
    %25 = vector.broadcast %21 : vector<8x1xf32> to vector<8x128xf32>
    %26 = arith.subf %11, %25 : vector<8x128xf32>
    %27 = math.exp %26 : vector<8x128xf32>
    %c0_15 = arith.constant 0 : index
    %c0_16 = arith.constant 0 : index
    %28 = vector.load %arg9[%c0_15, %c0_16] : memref<8x1xf32, #tpu.memory_space<vmem>>, vector<8x1xf32>
    %29 = arith.mulf %28, %24 : vector<8x1xf32>
    %cst_17 = arith.constant dense<0.000000e+00> : vector<8xf32>
    %30 = vector.multi_reduction <add>, %27, %cst_17 [1] : vector<8x128xf32> to vector<8xf32>
    %31 = vector.shape_cast %30 : vector<8xf32> to vector<8x1xf32>
    %32 = arith.addf %29, %31 : vector<8x1xf32>
    %c0_18 = arith.constant 0 : index
    %c0_19 = arith.constant 0 : index
    %33 = vector.load %arg9[%c0_18, %c0_19] : memref<8x1xf32, #tpu.memory_space<vmem>>, vector<8x1xf32>
    tpu.vector_store %arg9[%c0_18, %c0_19], %32 {strides = array<i32>} : memref<8x1xf32, #tpu.memory_space<vmem>>, vector<8x1xf32>,
    %c0_20 = arith.constant 0 : index
    %c0_21 = arith.constant 0 : index
    %c0_22 = arith.constant 0 : index
    %34 = vector.load %arg5[%c0_20, %c0_21, %c0_22] : memref<1x8x16xf32, #tpu.memory_space<vmem>>, vector<1x8x16xf32>
    %35 = vector.shape_cast %34 : vector<1x8x16xf32> to vector<8x16xf32>
    %36 = vector.broadcast %24 : vector<8x1xf32> to vector<8x16xf32>
    %37 = arith.mulf %35, %36 : vector<8x16xf32>
    %cst_23 = arith.constant dense<0.000000e+00> : vector<8x16xf32>
    %38 = tpu.matmul %27, %10, %cst_23 {dimension_numbers = #tpu.dot_dimension_numbers<[1], [1], [0], [0], [0, 0, 1, 0], [], []>} : vector<8x128xf32>, vector<16x128xf32>, vector<8x16xf32> -> vector<8x16xf32>
    %39 = arith.addf %37, %38 : vector<8x16xf32>
    %c0_24 = arith.constant 0 : index
    %c0_25 = arith.constant 0 : index
    %c0_26 = arith.constant 0 : index
    %40 = vector.load %arg5[%c0_24, %c0_25, %c0_26] : memref<1x8x16xf32, #tpu.memory_space<vmem>>, vector<1x8x16xf32>
    %41 = vector.shape_cast %40 : vector<1x8x16xf32> to vector<8x16xf32>
    %42 = vector.shape_cast %39 : vector<8x16xf32> to vector<1x8x16xf32>
    tpu.vector_store %arg5[%c0_24, %c0_25, %c0_26], %42 {strides = array<i32>} : memref<1x8x16xf32, #tpu.memory_space<vmem>>, vector<1x8x16xf32>,
    %c0_27 = arith.constant 0 : index
    %c0_28 = arith.constant 0 : index
    %43 = vector.load %arg8[%c0_27, %c0_28] : memref<8x1xf32, #tpu.memory_space<vmem>>, vector<8x1xf32>
    tpu.vector_store %arg8[%c0_27, %c0_28], %21 {strides = array<i32>} : memref<8x1xf32, #tpu.memory_space<vmem>>, vector<8x1xf32>,
    %c0_29 = arith.constant 0 : index
    %c0_30 = arith.constant 0 : index
    %c0_31 = arith.constant 0 : index
    %44 = vector.load %arg6[%c0_29, %c0_30, %c0_31] : memref<1x8x1xf32, #tpu.memory_space<vmem>>, vector<1x8x1xf32>
    %45 = vector.shape_cast %44 : vector<1x8x1xf32> to vector<8x1xf32>
    %cst_32 = arith.constant dense<0xFF800000> : vector<8xf32>
    %46 = vector.multi_reduction <maximumf>, %14, %cst_32 [1] : vector<8x128xf32> to vector<8xf32>
    %47 = vector.shape_cast %46 : vector<8xf32> to vector<8x1xf32>
    %48 = arith.maximumf %45, %47 : vector<8x1xf32>
    %c0_33 = arith.constant 0 : index
    %c0_34 = arith.constant 0 : index
    %49 = vector.load %arg10[%c0_33, %c0_34] : memref<8x1xf32, #tpu.memory_space<vmem>>, vector<8x1xf32>
    %c0_35 = arith.constant 0 : index
    %c0_36 = arith.constant 0 : index
    %c0_37 = arith.constant 0 : index
    %50 = vector.load %arg6[%c0_35, %c0_36, %c0_37] : memref<1x8x1xf32, #tpu.memory_space<vmem>>, vector<1x8x1xf32>
    %51 = vector.shape_cast %50 : vector<1x8x1xf32> to vector<8x1xf32>
    %52 = arith.subf %51, %48 : vector<8x1xf32>
    %53 = math.exp %52 : vector<8x1xf32>
    %54 = arith.mulf %49, %53 : vector<8x1xf32>
    %55 = vector.broadcast %48 : vector<8x1xf32> to vector<8x128xf32>
    %56 = arith.subf %14, %55 : vector<8x128xf32>
    %57 = math.exp %56 : vector<8x128xf32>
    %cst_38 = arith.constant dense<0.000000e+00> : vector<8xf32>
    %58 = vector.multi_reduction <add>, %57, %cst_38 [1] : vector<8x128xf32> to vector<8xf32>
    %59 = vector.shape_cast %58 : vector<8xf32> to vector<8x1xf32>
    %60 = arith.addf %54, %59 : vector<8x1xf32>
    %c0_39 = arith.constant 0 : index
    %c0_40 = arith.constant 0 : index
    %61 = vector.load %arg10[%c0_39, %c0_40] : memref<8x1xf32, #tpu.memory_space<vmem>>, vector<8x1xf32>
    tpu.vector_store %arg10[%c0_39, %c0_40], %60 {strides = array<i32>} : memref<8x1xf32, #tpu.memory_space<vmem>>, vector<8x1xf32>,
    %c0_41 = arith.constant 0 : index
    %c0_42 = arith.constant 0 : index
    %c0_43 = arith.constant 0 : index
    %62 = vector.load %arg6[%c0_41, %c0_42, %c0_43] : memref<1x8x1xf32, #tpu.memory_space<vmem>>, vector<1x8x1xf32>
    %63 = vector.shape_cast %62 : vector<1x8x1xf32> to vector<8x1xf32>
    %64 = vector.shape_cast %48 : vector<8x1xf32> to vector<1x8x1xf32>
    tpu.vector_store %arg6[%c0_41, %c0_42, %c0_43], %64 {strides = array<i32>} : memref<1x8x1xf32, #tpu.memory_space<vmem>>, vector<1x8x1xf32>,
    %c3_i32 = arith.constant 3 : i32
    %65 = arith.cmpi eq, %arg1, %c3_i32 : i32
    %66 = arith.extui %65 : i1 to i32
    %c0_i32_44 = arith.constant 0 : i32
    %67 = arith.cmpi ne, %66, %c0_i32_44 : i32
    scf.if %67 {
      %c0_45 = arith.constant 0 : index
      %c0_46 = arith.constant 0 : index
      %c0_47 = arith.constant 0 : index
      %68 = vector.load %arg5[%c0_45, %c0_46, %c0_47] : memref<1x8x16xf32, #tpu.memory_space<vmem>>, vector<1x8x16xf32>
      %69 = vector.shape_cast %68 : vector<1x8x16xf32> to vector<8x16xf32>
      %c0_48 = arith.constant 0 : index
      %c0_49 = arith.constant 0 : index
      %70 = vector.load %arg9[%c0_48, %c0_49] : memref<8x1xf32, #tpu.memory_space<vmem>>, vector<8x1xf32>
      %c0_50 = arith.constant 0 : index
      %c0_51 = arith.constant 0 : index
      %71 = vector.load %arg10[%c0_50, %c0_51] : memref<8x1xf32, #tpu.memory_space<vmem>>, vector<8x1xf32>
      %72 = arith.mulf %70, %71 : vector<8x1xf32>
      %cst_52 = arith.constant 1.000000e+00 : f32
      %73 = vector.broadcast %cst_52 : f32 to vector<8x1xf32>
      %74 = arith.divf %73, %72 : vector<8x1xf32>
      %75 = vector.broadcast %74 : vector<8x1xf32> to vector<8x16xf32>
      %76 = arith.mulf %69, %75 : vector<8x16xf32>
      %c0_53 = arith.constant 0 : index
      %c0_54 = arith.constant 0 : index
      %c0_55 = arith.constant 0 : index
      %77 = vector.load %arg5[%c0_53, %c0_54, %c0_55] : memref<1x8x16xf32, #tpu.memory_space<vmem>>, vector<1x8x16xf32>
      %78 = vector.shape_cast %77 : vector<1x8x16xf32> to vector<8x16xf32>
      %79 = vector.shape_cast %76 : vector<8x16xf32> to vector<1x8x16xf32>
      tpu.vector_store %arg5[%c0_53, %c0_54, %c0_55], %79 {strides = array<i32>} : memref<1x8x16xf32, #tpu.memory_space<vmem>>, vector<1x8x16xf32>,
    } else {
    }
    return
  }
  func.func @transform_0(%arg0: i32, %arg1: i32) -> (i32, i32, i32) {
    %c0_i32 = arith.constant 0 : i32
    %c0_i32_0 = arith.constant 0 : i32
    return %arg0, %c0_i32, %arg1 : i32, i32, i32
  }
  func.func @transform_1(%arg0: i32, %arg1: i32) -> (i32, i32) {
    %c0_i32 = arith.constant 0 : i32
    %c0_i32_0 = arith.constant 0 : i32
    %c0_i32_1 = arith.constant 0 : i32
    return %c0_i32, %c0_i32_0 : i32, i32
  }
  func.func @transform_2(%arg0: i32, %arg1: i32) -> (i32, i32) {
    %c0_i32 = arith.constant 0 : i32
    %c0_i32_0 = arith.constant 0 : i32
    %c0_i32_1 = arith.constant 0 : i32
    return %c0_i32, %c0_i32_0 : i32, i32
  }
  func.func @transform_3(%arg0: i32, %arg1: i32) -> (i32, i32, i32) {
    %c0_i32 = arith.constant 0 : i32
    %c0_i32_0 = arith.constant 0 : i32
    %c0_i32_1 = arith.constant 0 : i32
    return %arg0, %c0_i32, %c0_i32_0 : i32, i32, i32
  }
  func.func @transform_4(%arg0: i32, %arg1: i32) -> (i32, i32, i32) {
    %c0_i32 = arith.constant 0 : i32
    %c0_i32_0 = arith.constant 0 : i32
    %c0_i32_1 = arith.constant 0 : i32
    return %arg0, %c0_i32, %c0_i32_0 : i32, i32, i32
  }
  func.func @transform_5(%arg0: i32, %arg1: i32) -> (i32, i32, i32) {
    %c0_i32 = arith.constant 0 : i32
    %c0_i32_0 = arith.constant 0 : i32
    return %arg0, %c0_i32, %arg1 : i32, i32, i32
  }
}

</mosaic_0001>

<bundles_post_ra>
// kernel: tpu_custom_call.1
= control target key start
LH: loop header
LB: loop body
LE: loop exit
PB: predicated region body
PF: predicated region fallthrough
CT: control target
= control target key end

     0   :  { %11 = vsyncpa [#allocation6], 0  ;;  %s1307_s0 = inlined_call_operand.vmem [shape: bf16[2,8,512], index: 0, kind: input, shape index: {}]   ;;  %s1308_s1 = inlined_call_operand.vmem [shape: bf16[32,8], index: 1, kind: input, shape index: {}]   ;;  %s1309_s2 = inlined_call_operand.vmem [shape: f32[32,1], index: 2, kind: input, shape index: {}]   ;;  %s1310_s3 = inlined_call_operand.hbm [shape: f32[2,8,16], index: 3, kind: output, shape index: {0}]   ;;  %s1311_s4 = inlined_call_operand.vmem [shape: f32[2,8,1], index: 4, kind: output, shape index: {1}]   ;;  %s1312_s5 = inlined_call_operand.hbm [shape: bf16[2,8,512], index: 5, kind: output, shape index: {2}]  }
   0x1   :  { %13 = vsyncpa [#allocation6 + $0x1], 0 }
   0x2   :  { %14 = vsyncpa [#allocation8], 0 }
   0x3   :  { %16 = vsyncpa [#allocation8 + $0x1], 0  ;;  %s1050_s18 = smov 0   ;;  %s1052_s19 = smov 0  }
   0x4   :  { %s1054_s20 = smov 0   ;;  %s1056_s21 = smov 0  }
   0x5   :  { %s1058_s22 = smov 0   ;;  %s1060_s23 = smov 0  }
   0x6   :  { %s1062_s24 = smov 0   ;;  %s1064_s25 = smov 0  }
   0x7   :  { %s1066_s26 = smov 0   ;;  %s1068_s27 = smov 0  }
   0x8   :  { %s1070_s28 = smov 0  }
   0x9 LB: > { %1323 = sst [smem:[#allocation11_spill]] %s970_s18  ;;  %s700_s29 = sadd.s32 4294967295, %s1010_s28   ;;  %s1010_s28 = sphi %s1070_s28, %s22_s28   ;;  %s1006_s27 = sphi %s1068_s27, %s1352_s27   ;;  %s1002_s26 = sphi %s1066_s26, %s1351_s26   ;;  %s998_s25 = sphi %s1064_s25, %s1350_s25   ;;  %s994_s24 = sphi %s1062_s24, %s1349_s24   ;;  %s990_s23 = sphi %s1060_s23, %s1348_s23   ;;  %s986_s22 = sphi %s1058_s22, %s1356_s22   ;;  %s982_s21 = sphi %s1056_s21, %s1355_s21   ;;  %s978_s20 = sphi %s1054_s20, %s1346_s20   ;;  %s974_s19 = sphi %s1052_s19, %s1354_s19   ;;  %s970_s18 = sphi %s1050_s18, %s1353_s18  }
   0xa   : > { %1324 = sst [smem:[#allocation12_spill]] %s978_s20  ;;  %s701_s30 = sadd.s32 4294967294, %s1010_s28  }
   0xb   : > { %1325 = sst [smem:[#allocation13_spill]] %s990_s23  ;;  %s31_s6 = sadd.s32 1, %s1002_s26 }
   0xc   : > { %1326 = sst [smem:[#allocation14_spill]] %s1002_s26  ;;  %s34_s7 = sadd.s32 1, %s1006_s27 }
   0xd   : > { %1327 = sst [smem:[#allocation15_spill]] %s1006_s27  ;;  %p32_p0 = scmp.ge.s32.totalorder %s31_s6, 4 }
   0xe   : > { %s111_s8 = sadd.s32 1, %s990_s23  ;;  %p121_p1 = scmp.ne.s32.totalorder %s990_s23, %s986_s22 }
   0xf   : > { %p1112_p2 = scmp.eq.s32.totalorder %s700_s29, 7  ;;  %s1358_s6 = smov (%p32_p0, %s31_s6), 0 }
  0x10   : > { %1329 = sst [smem:[#allocation16_spill]] %s1358_s6  ;;  %s1360_s7 = smov (!%p32_p0, %s34_s7), %s1006_s27 }
  0x11   : > { %p1121_p3 = por %p1112_p2, %p121_p1  ;;  %p127_p4 = scmp.ne.s32.totalorder %s986_s22, %s982_s21 }
  0x12   : > { %p36_p5 = scmp.ge.s32.totalorder %s1360_s7, 2  ;;  %p1127_p6 = scmp.eq.s32.totalorder %s701_s30, 7 }
  0x13   : > { %s161_s12 = ssub.s32 %s1002_s26, %s1358_s6  ;;  %s165_s13 = sadd.s32 1, %s978_s20 }
  0x14   : > { %s1362_s7 = smov (%p36_p5, %s1360_s7), 0  ;;  %p1138_p7 = por %p1127_p6, %p127_p4 }
  0x15   : > { %1332 = sst [smem:[#allocation17_spill]] %s1362_s7  ;;  %p175_p8 = scmp.ne.s32.totalorder %s978_s20, %s974_s19 }
  0x16   : > { %s1333_s14 = scalar_select %p1138_p7, 1, 0 }
  0x17   : > { %s108_s15 = ssub.s32 %s1006_s27, %s1362_s7  ;;  %p181_p9 = scmp.ne.s32.totalorder %s974_s19, %s970_s18 }
  0x18   : > { %p109_p10 = scmp.eq.s32.totalorder %s108_s15, 0  ;;  %s162_s16 = sor.u32 %s161_s12, %s108_s15 }
  0x19   : > { %p163_p11 = scmp.eq.s32.totalorder %s162_s16, 0  ;;  %p1150_p12 = por %p175_p8, %p1112_p2 }
  0x1a   : > { %s1155_s29 = scalar_select %p109_p10, %s990_s23, %s111_s8  }
  0x1b   : > { %s1158_s30 = scalar_select %p163_p11, %s978_s20, %s165_s13  }
  0x1c   : > { %1335 = sst [smem:[#allocation18_spill]] %s1155_s29  ;;  %p1162_p13 = por %p181_p9, %p1127_p6 }
  0x1d   : > { %1336 = sst [smem:[#allocation19_spill]] %s1158_s30  ;;  %p704_p0 = scmp.ge.s32.totalorder %s1010_s28, 1 }
  0x1e   : > { %s1337_s6 = scalar_select %p1162_p13, 1, 0 }
  0x1f   : > { %p217_p1 = scmp.lt.s32.totalorder %s1010_s28, 9 }
  0x20   : > { %1338 = sst [smem:[#allocation20_spill]] %s1337_s6 }
  0x21   : > { %p218_p4 = pnand %p704_p0, %p217_p1 }
  0x22   : > { %s1320_s8 = sand.u32 (!%p218_p4), 1, %s986_s22   ;;  %s1321_s9 = sand.u32 (!%p218_p4), 1, %s974_s19  }
  0x23   : > { %221 = sbr.rel (%p218_p4) target bundleno = 1059 (0x423), region = 32  ;;  %s705_s11 = sshll.u32 (!%p218_p4), %s1320_s8, 3 }
  0x24   : > { %s1174_s12 = sshll.u32 (!%p218_p4), %s1321_s9, 2  ;;  %p257_p2 = scmp.lt.s32.totalorder (!%p218_p4), %s998_s25, 1 }
  0x25   : > { %p259_p5 = scmp.lt.s32.totalorder (!%p218_p4), %s994_s24, 3  ;;  %s1188_s9 = scalar_lea.vmem (!%p218_p4), [#allocation5], %s705_s11 }
  0x26   : > { %s256_s18 = scalar_lea.vmem (!%p218_p4), [#allocation7], %s1174_s12  ;;  %p710_p6 = scmp.ne.s32.totalorder (!%p218_p4), %s994_s24, 0 }
  0x28   : > { %s258_s13 = scalar_select %p257_p2, %s998_s25, 1 }
  0x29   : > { %s260_s15 = scalar_select %p259_p5, %s994_s24, 3 }
  0x2a   : > { %s707_s16 = sshll.u32 %s258_s13, 2  ;;  %s709_s7 = sshll.u32 %s258_s13, 3 }
  0x2b   : > { %s262_s27 = sadd.s32 %s707_s16, %s260_s15  ;;  %s1183_s23 = scalar_lea.vmem %s1311_s4, %s709_s7 }
  0x2c   : > { %s708_s30 = sshll.u32 %s262_s27, 2  ;;  %273 = sbr.rel (%p710_p6) target bundleno = 53 (0x35), region = 36 }
  0x2d   : > { %s264_s8 = scalar_lea.vmem %s1307_s0, %s708_s30 }
  0x31   : > { %vm274_vm0 = vcmask 130048   ;;  %vm276_vm1 = vcmask 7168   ;;  %v1012_v0 = vmov 0.0   ;;  %v1013_v1 = vmov -1e+30  }
  0x32   : > { %275 = vst.msk [vmem:[%s1188_s9] sm:$0xff] %vm274_vm0, %v1012_v0 }
  0x33   : > { %277 = vst.msk [vmem:[%s1183_s23] sm:$0xff] %vm276_vm1, %v1013_v1  ;;  %278 = vst.msk [vmem:[#allocation2] sm:$0xff] %vm276_vm1, %v1013_v1 }
  0x34   : > { %279 = vst.msk [vmem:[#allocation3] sm:$0xff] %vm276_vm1, %v1012_v0  ;;  %280 = vst.msk [vmem:[#allocation4] sm:$0xff] %vm276_vm1, %v1012_v0 }
  0x35 PF: > { %v285_v2 = vld [vmem:[%s264_s8] sm:$0xf]  ;;  %vm327_vm2 = vcmask 1043456   ;;  %vm320_vm3 = vcmask 64512   ;;  %v852_v5 = vld [vmem:[%s1308_s1 + $0x8] sm:$0xff]   ;;  %v288_v6 = vld [vmem:[%s1309_s2 + $0x10] sm:$0xff] }
  0x36   : > { %v851_v3 = vld [vmem:[%s1308_s1] sm:$0xff]   ;;  %742 = vmatprep.subr.msk.bf16.mxu0 %vm327_vm2, %v285_v2  ;;  %v329_v4 = vsel %vm327_vm2, %v285_v2, 0  ;;  %v1014_v7 = vmov 0   ;;  %v289_v8 = vld [vmem:[%s1309_s2 + $0x18] sm:$0xff]  ;;  %vm403_vm4 = vcmask 7168   ;;  %v287_v21 = vld [vmem:[%s1309_s2 + $0x8] sm:$0xff] }
  0x37   : > { %730 = vmatpush3.bf16.msra.mxu0 %v329_v4  ;;  %731 = vmatprep.mubr.msk.bf16.mxu0 %vm320_vm3, %v851_v3  ;;  %v1015_v22 = vmov 0.0   ;;  %v286_v23 = vld [vmem:[%s1309_s2] sm:$0xff]  ;;  %vm1016_vm5 = vmmov 0   ;;  %vm483_vm6 = vcmask 130048   ;;  %p715_p8 = scmp.ne.s32.totalorder %s994_s24, 3 }
  0x38   : > { %849 = vset.pattern.permute.xlu0 %v1014_v7  ;;  %850 = vset.pattern.permute.xlu1 %v1014_v7 }
  0x39   : > { %302 = vperm.xlu0 %849, %v288_v6   ;;  %307 = vperm.xlu1 %850, %v289_v8   ;;  %v405_v48 = vld [vmem:[%s1188_s9] sm:$0xff] }
  0x3a   : > { %732 = vmatmul.mubr.msk.bf16.vlgmr.msra.gmra.mxu0 %vm320_vm3, %v852_v5  ;;  %v383_v17 = vld [vmem:[#allocation2] sm:$0xff]  ;;  %735 = vmatprep.subr.mxu1 %v1015_v22 }
  0x3b   : > { %739 = vmatprep.mubr.msk.f32.mxu1 %vm1016_vm5, %v1015_v22  ;;  %v486_v35 = vld [vmem:[%s1183_s23] sm:$0xff]  ;;  %v398_v40 = vld [vmem:[#allocation3] sm:$0xff]  ;;  %v490_v56 = vld [vmem:[#allocation4] sm:$0xff] }
  0xb4   : > { %v303_v9 = vpop.permute.xlu0 %302  ;;  %v308_v13 = vpop.permute.xlu1 %307 }
  0xfa   : > { %v733_v10 = vpop.f32.mrf.mxu0 }
  0xfb   : > { %v374_v11 = vadd.f32 %v733_v10, %v303_v9 }
  0xfc   : > { %v365_v12 = vpop.f32.mrf.mxu0 }
  0xfd   : > { %384 = vmax.xlane.f32.xlu0 %v374_v11 }
  0xfe   : > { %v734_v14 = vpop.f32.mrf.mxu0 }
  0xff   : > { %v377_v15 = vadd.f32 %v734_v14, %v308_v13 }
 0x100   : > { %v368_v28 = vpop.f32.mrf.mxu0 }
 0x101   : > { %v380_v16 = vpack.c.bf16 %v377_v15, %v377_v15 }
 0x103   : > { %382 = vst [vmem:[%s256_s18] sm:$0xf] %v380_v16  ;;  %v381_v24 = vunpack.c.l.bf16 %v380_v16 }
 0x186   : > { %v385_v18 = vpop.xlane.xlu0 %384 }
 0x187   : > { %v386_v19 = vmax.f32 %v383_v17, %v385_v18 }
 0x189   : > { %v387_v20 = vsub.f32 %v383_v17, %v386_v19  ;;  %485 = vst.msk [vmem:[#allocation2] sm:$0xff] %vm403_vm4, %v386_v19  ;;  %392 = vperm.xlu1 %850, %v386_v19  }
 0x18b   : > { %v388_v34 = vmul.f32 1.442695, %v387_v20 }
 0x18d   : > { %297 = vperm.xlu1 %850, %v287_v21  }
 0x191   : > { %292 = vperm.xlu1 %850, %v286_v23  }
 0x1b5   : > { %487 = vmax.xlane.f32.xlu1 %v381_v24 }
 0x204   : > { %v393_v25 = vpop.permute.xlu1 %392 }
 0x205   : > { %v395_v26 = vsub.f32 %v374_v11, %v393_v25 }
 0x207   : > { %v396_v27 = vmul.f32 1.442695, %v395_v26 }
 0x208   : > { %v298_v29 = vpop.permute.xlu1 %297 }
 0x209   : > { %853 = vpow2.f32 %v396_v27  ;;  %v369_v30 = vadd.f32 %v368_v28, %v298_v29 }
 0x20a   : > { %855 = vpow2.f32 %v388_v34 }
 0x20b   : > { %736 = vmatpush3.xpose.msra.mxu1 %v369_v30 }
 0x20c   : > { %v293_v31 = vpop.permute.xlu1 %292  ;;  %737 = vmatprep.subr.mxu1 %v1015_v22 }
 0x20d   : > { %v366_v32 = vadd.f32 %v365_v12, %v293_v31 }
 0x20f   : > { %738 = vmatpush3.xpose.msra.mxu1 %v366_v32 }
 0x216   : > { %v854_v33 = vpop.eup %853 }
 0x217   : > { %400 = vadd.xlane.f32.xlu1 %v854_v33  ;;  %740 = vmatmul.mubr.f32.vlgmr.msra.gmra.mxu1 %v854_v33  ;;  %v856_v39 = vpop.eup %855 }
 0x218   : > { %v399_v41 = vmul.f32 %v856_v39, %v398_v40 }
 0x23e   : > { %v488_v36 = vpop.xlane.xlu1 %487 }
 0x23f   : > { %v489_v37 = vmax.f32 %v486_v35, %v488_v36 }
 0x241   : > { %v491_v38 = vsub.f32 %v486_v35, %v489_v37  ;;  %507 = vst.msk [vmem:[%s1183_s23] sm:$0xff] %vm403_vm4, %v489_v37  ;;  %497 = vperm.xlu0 %849, %v489_v37  }
 0x243   : > { %v492_v54 = vmul.f32 1.442695, %v491_v38 }
 0x245   : > { %408 = vperm.xlu0 %849, %v856_v39  }
 0x2a0   : > { %v401_v42 = vpop.xlane.xlu1 %400 }
 0x2a1   : > { %v402_v43 = vadd.f32 %v401_v42, %v399_v41 }
 0x2a3   : > { %404 = vst.msk [vmem:[#allocation3] sm:$0xff] %vm403_vm4, %v402_v43 }
 0x2bc   : > { %v498_v44 = vpop.permute.xlu0 %497 }
 0x2bd   : > { %v500_v45 = vsub.f32 %v381_v24, %v498_v44 }
 0x2bf   : > { %v501_v46 = vmul.f32 1.442695, %v500_v45 }
 0x2c0   : > { %v409_v49 = vpop.permute.xlu0 %408 }
 0x2c1   : > { %857 = vpow2.f32 %v501_v46  ;;  %v411_v50 = vmul.f32 %v409_v49, %v405_v48 }
 0x2c2   : > { %859 = vpow2.f32 %v492_v54 }
 0x2ce   : > { %v858_v47 = vpop.eup %857 }
 0x2cf   : > { %503 = vadd.xlane.f32.xlu1 %v858_v47  ;;  %v860_v55 = vpop.eup %859 }
 0x2d0   : > { %v494_v57 = vmul.f32 %v860_v55, %v490_v56 }
 0x2d7   : > { %v478_v51 = vpop.f32.mrf.mxu1 }
 0x2d8   : > { %v482_v52 = vadd.f32 %v478_v51, %v411_v50 }
 0x2d9   : > { %v741_v53 = vpop.f32.mrf.mxu1 }
 0x2da   : > { %484 = vst.msk [vmem:[%s1188_s9] sm:$0xff] %vm483_vm6, %v482_v52 }
 0x357   : > { %511 = sbr.rel (%p715_p8) target bundleno = 1010 (0x3f2), region = 40 }
 0x358   : > { %v504_v58 = vpop.xlane.xlu1 %503 }
 0x359   : > { %v505_v59 = vadd.f32 %v504_v58, %v494_v57 }
 0x35b   : > { %506 = vst.msk [vmem:[#allocation4] sm:$0xff] %vm403_vm4, %v505_v59 }
 0x35c   : > { %v513_v60 = vld [vmem:[#allocation3] sm:$0xff]  ;;  %v1017_v62 = vmov 0   ;;  %v512_v1 = vld [vmem:[%s1188_s9] sm:$0xff] }
 0x35d   : > { %861 = vset.pattern.permute.xlu0 %v1017_v62 }
 0x362   : > { %v514_v61 = vld [vmem:[#allocation4] sm:$0xff] }
 0x363   : > { %v515_v63 = vmul.f32 %v514_v61, %v513_v60 }
 0x365   : > { %862 = vrcp.f32 %v515_v63 }
 0x372   : > { %v863_v0 = vpop.eup %862 }
 0x373   : > { %520 = vperm.xlu0 %861, %v863_v0  }
 0x3ee   : > { %v521_v2 = vpop.permute.xlu0 %520 }
 0x3ef   : > { %v523_v3 = vmul.f32 %v521_v2, %v512_v1 }
 0x3f1   : > { %524 = vst.msk [vmem:[%s1188_s9] sm:$0xff] %vm483_vm6, %v523_v3 }
 0x3f2 PF: > { %s718_s23 = sshll.u32 %s998_s25, 7  ;;  %s548_s6 = sshll.u32 %s1188_s9, 4  ;;  %s549_s6 = int_to_ptr.vmem [resolvable:$true] %s548_s6 }
 0x3f3   : > { %s546_s27 = scalar_lea.hbm %s1310_s3, %s718_s23  ;;  %s1339_s7 = sand.u32 1, %s986_s22  }
 0x3f4   : > { %s526_s29 = scalar_lea.sflag [#allocation6], %s1339_s7  ;;  %s864_s30 = scalar_lea.vmem %s549_s6, 128 }
 0x3f5   : > { %p865_p9 = scmp.ne.s32.totalorder %s549_s6, %s864_s30  ;;  %s1018_s8 = smov [#allocation5]  }
 0x3f6   : > { %s868_s11 = sshll.u32 %s1018_s8, 4  ;;  %s869_s11 = int_to_ptr.vmem [resolvable:$false] %s868_s11 }
 0x3f7   : > { %p866_p10 = pnand %p865_p9, %p1121_p3  ;;  %s870_s13 = scalar_lea.vmem %s869_s11, 256 }
 0x3f8   : > { %p871_p0 = scmp.lt.s32.totalorder %s549_s6, %s869_s11  ;;  %p872_p1 = scmp.lt.s32.totalorder %s870_s13, %s864_s30 }
 0x3f9   : > { %p867_p11 = pneg %p866_p10 }
 0x3fa   : > { %p873_p4 = por %p872_p1, %p871_p0 }
 0x3fc   : > { %p874_p2 = pnand %p873_p4, %p867_p11 }
 0x3fe   : > { %877 = shalt.err (!%p874_p2)
}
 0x3ff   : > { %s878_s15 = scalar_lea.hbm %s546_s27, 128  ;;  %s882_s23 = scalar_lea.hbm %s1310_s3, 256 }
 0x400   : > { %p879_p5 = scmp.ne.s32.totalorder %s546_s27, %s878_s15  ;;  %p883_p9 = scmp.lt.s32.totalorder %s546_s27, %s1310_s3 }
 0x401   : > { %p884_p10 = scmp.lt.s32.totalorder %s882_s23, %s878_s15 }
 0x402   : > { %p880_p6 = pnand %p879_p5, %p1121_p3 }
 0x403   : > { %p885_p13 = por %p884_p10, %p883_p9 }
 0x404   : > { %p881_p8 = pneg %p880_p6 }
 0x406   : > { %p886_p7 = pnand %p885_p13, %p881_p8 }
 0x408   : > { %889 = shalt.err (!%p886_p7)
}
 0x409   : > { %743 = dma.vmem_to_hbm [thread:$0]  (%p1121_p3), %s549_s6, 128, %s546_s27, %s526_s29  }
 0x40a   : > { %s719_s7 = sshll.u32 %s998_s25, 2  ;;  %s566_s30 = sshll.u32 %s256_s18, 4  ;;  %s567_s30 = int_to_ptr.vmem [resolvable:$true] %s566_s30 }
 0x40b   : > { %s562_s8 = sadd.s32 %s994_s24, %s719_s7  ;;  %s1340_s16 = sand.u32 1, %s974_s19  }
 0x40c   : > { %s720_s11 = sshll.u32 %s562_s8, 6  ;;  %s535_s23 = scalar_lea.sflag [#allocation8], %s1340_s16 }
 0x40d   : > { %s564_s15 = scalar_lea.hbm %s1312_s5, %s720_s11  ;;  %s890_s20 = scalar_lea.vmem %s567_s30, 64 }
 0x40e   : > { %p891_p7 = scmp.ne.s32.totalorder %s567_s30, %s890_s20  ;;  %s1019_s10 = smov [#allocation7]  }
 0x40f   : > { %s894_s26 = sshll.u32 %s1019_s10, 4  ;;  %s895_s26 = int_to_ptr.vmem [resolvable:$false] %s894_s26 }
 0x410   : > { %p892_p13 = pnand %p891_p7, %p1150_p12  ;;  %s896_s25 = scalar_lea.vmem %s895_s26, 128 }
 0x411   : > { %p897_p3 = scmp.lt.s32.totalorder %s567_s30, %s895_s26  ;;  %p898_p0 = scmp.lt.s32.totalorder %s896_s25, %s890_s20 }
 0x412   : > { %p893_p11 = pneg %p892_p13 }
 0x413   : > { %p899_p1 = por %p898_p0, %p897_p3 }
 0x415   : > { %p900_p4 = pnand %p899_p1, %p893_p11 }
 0x417   : > { %903 = shalt.err (!%p900_p4)
}
 0x418   : > { %s904_s18 = scalar_lea.hbm %s564_s15, 64  ;;  %s908_s27 = scalar_lea.hbm %s1312_s5, 512 }
 0x419   : > { %p905_p2 = scmp.ne.s32.totalorder %s564_s15, %s904_s18  ;;  %p909_p8 = scmp.lt.s32.totalorder %s564_s15, %s1312_s5 }
 0x41a   : > { %p910_p9 = scmp.lt.s32.totalorder %s908_s27, %s904_s18 }
 0x41b   : > { %p906_p5 = pnand %p905_p2, %p1150_p12 }
 0x41c   : > { %p911_p10 = por %p910_p9, %p909_p8 }
 0x41d   : > { %p907_p6 = pneg %p906_p5 }
 0x41f   : > { %p912_p7 = pnand %p911_p10, %p907_p6 }
 0x421   : > { %915 = shalt.err (!%p912_p7)
}
 0x422   : > { %744 = dma.vmem_to_hbm [thread:$0]  (%p1150_p12), %s567_s30, 64, %s564_s15, %s535_s23  }
 0x423 PF: > { %p754_p13 = scmp.ge.s32.totalorder %s1010_s28, 2  ;;  %s578_s7 = sand.u32 1, %s982_s21  }
 0x424   : > { %p1341_p11 = scmp.ne.s32.totalorder %s1333_s14, 0  ;;  %s579_s8 = scalar_lea.sflag [#allocation6], %s578_s7 }
 0x426   : > { %p748_p3 = pnand %p754_p13, %p1341_p11 }
 0x428   : > { %p749_p0 = pneg %p748_p3 }
 0x42a   : > { %961 = dma.done.wait (%p749_p0), %s579_s8, 128  }
 0x42b   : > { %963 = vsyncadd (%p749_p0), %s579_s8, 4294967168  ;;  %s1342_s11 = sld [smem:[#allocation11_spill]] }
 0x42c   : > { %s1343_s13 = sld [smem:[#allocation20_spill]] }
 0x431   : > { %s594_s9 = sand.u32 1, %s1342_s11  }
 0x432   : > { %p1344_p1 = scmp.ne.s32.totalorder %s1343_s13, 0  ;;  %s595_s17 = scalar_lea.sflag [#allocation8], %s594_s9 }
 0x434   : > { %p751_p4 = pnand %p754_p13, %p1344_p1 }
 0x436   : > { %p752_p2 = pneg %p751_p4 }
 0x438   : > { %965 = dma.done.wait (%p752_p2), %s595_s17, 64  }
 0x439   : > { %967 = vsyncadd (%p752_p2), %s595_s17, 4294967232  ;;  %s22_s28 = sadd.s32 1, %s1010_s28   ;;  %s1345_s21 = sld [smem:[#allocation12_spill]] }
 0x43a   : > { %p19_p12 = scmp.ge.s32.totalorder %s22_s28, 10   ;;  %s1346_s20 = sld [smem:[#allocation19_spill]] }
 0x43b   : > { %s1347_s14 = sld [smem:[#allocation13_spill]]  ;;  %s1353_s18 = smov %s974_s19 }
 0x43c   : > { %s1348_s23 = sld [smem:[#allocation18_spill]] }
 0x43d   : > { %s1349_s24 = sld [smem:[#allocation14_spill]]  ;;  %21 = sbr.rel (!%p19_p12) target bundleno = 9 (0x9), region = 104 }
 0x43e   : > { %s1350_s25 = sld [smem:[#allocation15_spill]] }
 0x43f   : > { %s1351_s26 = sld [smem:[#allocation16_spill]]  ;;  %s1354_s19 = smov %s1345_s21 }
 0x440   : > { %s1352_s27 = sld [smem:[#allocation17_spill]]  ;;  %s1355_s21 = smov %s986_s22 }
 0x441   : > { %s1356_s22 = smov %s1347_s14 }
 0x442   :  { %600 = vsyncpa [#allocation6], 1 }
 0x443   :  { %602 = vsyncpa [#allocation6 + $0x1], 1 }
 0x444   :  { %603 = vsyncpa [#allocation8], 1 }
 0x445   :  { %605 = vsyncpa [#allocation8 + $0x1], 1 }

</bundles_post_ra>
